<compile_context>
chip_gen: v7x
topology: tpu7x:2x2x1
jax: 0.10.0
libtpu: 0.0.40
codegen_flags: <defaults>
</compile_context>

<pallas_src>
import functools

import jax
import jax.numpy as jnp
from jax import lax
from jax.experimental import pallas as pl
from jax.experimental.pallas import tpu as pltpu


def _round_up(x, m):
    return (x + m - 1) // m * m


@functools.lru_cache(maxsize=None)
def _roll_sign():
    """Returns s in {-1, +1} such that
       pltpu.roll(x, (s * off) % L, axis=-1)[..., m] == x[..., (m + off) % L].

    Tiny one-time probe so the im2col gather is robust to the rotate-direction
    convention of the hardware roll primitive.
    """
    x = jnp.arange(8 * 128, dtype=jnp.float32).reshape(8, 128)

    def probe(x_ref, o_ref):
        o_ref[...] = pltpu.roll(x_ref[...], 1, 1)

    y = pl.pallas_call(
        probe, out_shape=jax.ShapeDtypeStruct((8, 128), jnp.float32))(x)
    # jnp.roll convention: y[:, i] == x[:, i-1]  ->  reading x[m+off] needs
    # shift = -off; otherwise shift = +off.
    return -1 if bool(jnp.allclose(y, jnp.roll(x, 1, axis=1))) else 1


# -----------------------------------------------------------------------------
# Fused conv3x3 (SAME) + training-mode BatchNorm + ReLU on a channel-major
# (C, M) activation, entirely in-VMEM values.
# -----------------------------------------------------------------------------
def _conv3x3_bn_relu(x, w_t, gamma, beta, *, H, W, eps, roll_sign):
    # x     : (Cin_p, M)  channel-major activation, M = N*H*W (n-major, h, w)
    # w_t   : (Cout_p, 9*Cin_p)  columns ordered (kh, kw, cin)
    # gamma : (Cout_p, 1), beta : (Cout_p, 1)
    _, M = x.shape

    pos = lax.broadcasted_iota(jnp.int32, (1, M), 1)
    wp = pos % W                # w coordinate of each flattened position
    hp = (pos // W) % H         # h coordinate

    taps = []
    for dh in (-1, 0, 1):
        for dw in (-1, 0, 1):
            off = dh * W + dw   # flat-index offset of neighbour (h+dh, w+dw)
            if off == 0:
                taps.append(x)
                continue
            # shifted[:, m] == x[:, (m + off) % M]; wrapped / cross-row /
            # cross-image positions are exactly the masked positions below
            # (they implement the zero padding of the SAME conv).
            shifted = pltpu.roll(x, (roll_sign * off) % M, 1)
            valid = ((hp + dh >= 0) & (hp + dh < H) &
                     (wp + dw >= 0) & (wp + dw < W))
            taps.append(jnp.where(valid, shifted, 0.0))

    patches = jnp.concatenate(taps, axis=0)                 # (9*Cin_p, M)

    # Single MXU matmul with K = 9*Cin_p.  (Casting patches/w_t to bf16 here
    # gives ~2-3x on the v6e/v7x MXU if the small accuracy loss is acceptable;
    # kept in f32 for exact reference matching.)
    y = jnp.dot(w_t, patches, preferred_element_type=jnp.float32)  # (Cout_p, M)

    # Training-mode BatchNorm over all of M (= N*H*W), two-pass variance.
    mean = jnp.mean(y, axis=1, keepdims=True)
    var = jnp.mean(jnp.square(y - mean), axis=1, keepdims=True)
    scale = gamma * lax.rsqrt(var + eps)
    return jnp.maximum((y - mean) * scale + beta, 0.0)        # lane-dense (Cout_p, M)


def _conv_block_kernel(x_ref, w1_ref, g1_ref, b1_ref, w2_ref, g2_ref, b2_ref,
                       o_ref, *, H, W, eps, roll_sign):
    a1 = _conv3x3_bn_relu(x_ref[...], w1_ref[...], g1_ref[...], b1_ref[...],
                          H=H, W=W, eps=eps, roll_sign=roll_sign)
    o_ref[...] = _conv3x3_bn_relu(a1, w2_ref[...], g2_ref[...], b2_ref[...],
                                  H=H, W=W, eps=eps, roll_sign=roll_sign)


# -----------------------------------------------------------------------------
# Wrapper: layout/padding plumbing (all cheap XLA-side work).
# -----------------------------------------------------------------------------
def _prep_weight(w_hwio, cin_p, cout_p):
    # (3, 3, Cin, Cout) HWIO -> (Cout_p, 9*Cin_p), columns ordered (kh, kw, cin).
    _, _, cin, cout = w_hwio.shape
    w = jnp.zeros((3, 3, cin_p, cout_p), jnp.float32)
    w = w.at[:, :, :cin, :cout].set(w_hwio.astype(jnp.float32))
    return w.reshape(9 * cin_p, cout_p).T


def _prep_channel_vec(v, c_p):
    out = jnp.zeros((c_p, 1), jnp.float32)
    return out.at[:v.shape[0], 0].set(v.astype(jnp.float32))


def conv_block_forward(x_nchw, params, eps=1e-5):
    # x_nchw: (N, Cin, H, W), like the PyTorch module input.
    N, cin, H, W = x_nchw.shape
    M = N * H * W
    c1 = params["w1"].shape[-1]
    c2 = params["w2"].shape[-1]
    cin_p, c1_p, c2_p = (_round_up(c, 8) for c in (cin, c1, c2))

    roll_sign = _roll_sign()

    # Channel-major, lane-dense activation: (Cin_p, N*H*W).
    x_cm = jnp.transpose(x_nchw.astype(jnp.float32), (1, 0, 2, 3)).reshape(cin, M)
    x_cm = jnp.pad(x_cm, ((0, cin_p - cin), (0, 0)))

    w1_t = _prep_weight(params["w1"], cin_p, c1_p)
    w2_t = _prep_weight(params["w2"], c1_p, c2_p)
    g1 = _prep_channel_vec(params["gamma1"], c1_p)
    b1 = _prep_channel_vec(params["beta1"], c1_p)
    g2 = _prep_channel_vec(params["gamma2"], c2_p)
    b2 = _prep_channel_vec(params["beta2"], c2_p)
    # Conv biases (params["b1"], params["b2"]) are intentionally unused:
    # training-mode BatchNorm subtracts the batch mean, so they cancel exactly
    # in the module output (verified against the bias-including reference).

    kernel = functools.partial(_conv_block_kernel, H=H, W=W, eps=eps,
                               roll_sign=roll_sign)
    out_cm = pl.pallas_call(
        kernel,
        out_shape=jax.ShapeDtypeStruct((c2_p, M), jnp.float32),
        grid=(1,),
        in_specs=[
            pl.BlockSpec((cin_p, M), lambda i: (0, 0)),
            pl.BlockSpec((c1_p, 9 * cin_p), lambda i: (0, 0)),
            pl.BlockSpec((c1_p, 1), lambda i: (0, 0)),
            pl.BlockSpec((c1_p, 1), lambda i: (0, 0)),
            pl.BlockSpec((c2_p, 9 * c1_p), lambda i: (0, 0)),
            pl.BlockSpec((c2_p, 1), lambda i: (0, 0)),
            pl.BlockSpec((c2_p, 1), lambda i: (0, 0)),
        ],
        out_specs=pl.BlockSpec((c2_p, M), lambda i: (0, 0)),
        compiler_params=pltpu.CompilerParams(
            dimension_semantics=("arbitrary",)),
    )(x_cm, w1_t, g1, b1, w2_t, g2, b2)

    out = out_cm[:c2].reshape(c2, N, H, W)
    return jnp.transpose(out, (1, 0, 2, 3))  # -> NCHW


# -----------------------------------------------------------------------------
# Pure-JAX reference (conv WITH bias; BN in training mode) for verification.
# -----------------------------------------------------------------------------
def conv_block_reference(x_nchw, params, eps=1e-5):
    x = jnp.transpose(x_nchw, (0, 2, 3, 1)).astype(jnp.float32)
    for layer in ("1", "2"):
        w, b = params[f"w{layer}"], params[f"b{layer}"]
        gamma, beta = params[f"gamma{layer}"], params[f"beta{layer}"]
        y = lax.conv_general_dilated(
            x, w, window_strides=(1, 1), padding="SAME",
            dimension_numbers=("NHWC", "HWIO", "NHWC")) + b
        mean = jnp.mean(y, axis=(0, 1, 2))
        var = jnp.mean((y - mean) ** 2, axis=(0, 1, 2))
        x = jnp.maximum((y - mean) / jnp.sqrt(var + eps) * gamma + beta, 0.0)
    return jnp.transpose(x, (0, 3, 1, 2))


if __name__ == "__main__":
    key = jax.random.PRNGKey(0)
    N, Cin, Cout, H, W = 2, 4, 8, 16, 16

    k = jax.random.split(key, 9)
    params = {
        # HWIO weights (equivalent to PyTorch (Cout,Cin,3,3).permute(2,3,1,0))
        "w1": jax.random.normal(k[0], (3, 3, Cin, Cout), jnp.float32) * 0.1,
        "b1": jax.random.normal(k[1], (Cout,), jnp.float32) * 0.05,
        "gamma1": 1.0 + 0.1 * jax.random.normal(k[2], (Cout,), jnp.float32),
        "beta1": 0.05 * jax.random.normal(k[3], (Cout,), jnp.float32),
        "w2": jax.random.normal(k[4], (3, 3, Cout, Cout), jnp.float32) * 0.1,
        "b2": jax.random.normal(k[5], (Cout,), jnp.float32) * 0.05,
        "gamma2": 1.0 + 0.1 * jax.random.normal(k[6], (Cout,), jnp.float32),
        "beta2": 0.05 * jax.random.normal(k[7], (Cout,), jnp.float32),
    }

    x = jax.random.normal(k[8], (N, Cin, H, W), jnp.float32)  # NCHW (PyTorch)

    out = jax.block_until_ready(conv_block_forward(x, params))
    ref = jax.block_until_ready(conv_block_reference(x, params))

    assert out.shape == (N, Cout, H, W), out.shape
    max_err = float(jnp.max(jnp.abs(out - ref)))
    assert jnp.allclose(out, ref, atol=1e-4, rtol=1e-4), max_err

    print("KERNEL_OK")
</pallas_src>

<mosaic_0001>
module attributes {stable_mosaic.version = 11 : i64} {
  func.func @probe(%arg0: memref<8x128xf32, #tpu.memory_space<vmem>>, %arg1: memref<8x128xf32, #tpu.memory_space<vmem>>) attributes {dimension_semantics = [], scalar_prefetch = 0 : i64, scratch_operands = 0 : i64, tpu.core_type = #tpu.core_type<tc>} {
    %c0 = arith.constant 0 : index
    %c0_0 = arith.constant 0 : index
    %0 = vector.load %arg0[%c0, %c0_0] : memref<8x128xf32, #tpu.memory_space<vmem>>, vector<8x128xf32>
    %c1_i32 = arith.constant 1 : i32
    %1 = tpu.dynamic_rotate %0 by %c1_i32 dim 1 : vector<8x128xf32>, i32 -> vector<8x128xf32>
    %c0_1 = arith.constant 0 : index
    %c0_2 = arith.constant 0 : index
    %2 = vector.load %arg1[%c0_1, %c0_2] : memref<8x128xf32, #tpu.memory_space<vmem>>, vector<8x128xf32>
    tpu.vector_store %arg1[%c0_1, %c0_2], %1 {strides = array<i32>} : memref<8x128xf32, #tpu.memory_space<vmem>>, vector<8x128xf32>,
    return
  }
}

</mosaic_0001>

<bundles_post_ra>
// kernel: tpu_custom_call.1
= control target key start
LH: loop header
LB: loop body
LE: loop exit
PB: predicated region body
PF: predicated region fallthrough
CT: control target
= control target key end

     0   :  { %6 = vsyncpa [#allocation3], 0  ;;  %s128_s0 = inlined_call_operand.hbm [shape: f32[8,128], index: 0, kind: input, shape index: {}]   ;;  %s129_s1 = inlined_call_operand.hbm [shape: f32[8,128], index: 1, kind: output, shape index: {}]  }
   0x1   :  { %7 = vsyncpa [#allocation4], 0  ;;  %s91_s6 = smov [#allocation2]   ;;  %s43_s10 = scalar_lea.hbm %s128_s0, 128 }
   0x2   :  { %s14_s7 = sshll.u32 %s91_s6, 4  ;;  %p44_p0 = scmp.ne.s32.totalorder %s128_s0, %s43_s10  ;;  %s15_s7 = int_to_ptr.vmem [resolvable:$true] %s14_s7 }
   0x3   :  { %p47_p1 = scmp.lt.u32.totalorder %s43_s10, %s128_s0 }
   0x5   :  { %p49_p2 = pnand %p47_p1, %p44_p0 }
   0x7   :  { %52 = shalt.err (!%p49_p2)
}
   0x8   :  { %s53_s15 = scalar_lea.vmem %s15_s7, 128  ;;  %p58_p4 = scmp.lt.s32.totalorder %s15_s7, %s15_s7 }
   0x9   :  { %p54_p3 = scmp.ne.s32.totalorder %s15_s7, %s53_s15  ;;  %p59_p5 = scmp.lt.s32.totalorder %s53_s15, %s53_s15 }
   0xb   :  { %p60_p6 = por %p59_p5, %p58_p4 }
   0xd   :  { %p61_p7 = pnand %p60_p6, %p54_p3 }
   0xf   :  { %64 = shalt.err (!%p61_p7)
}
  0x10   :  { %17 = dma.hbm_to_vmem [thread:$0]  %s128_s0, 128, %s15_s7, [#allocation3]  }
  0x11   :  { %87 = dma.done.wait [#allocation3], 128  }
  0x12   :  { %88 = vsyncadd [#allocation3], 4294967168  ;;  %v21_v0 = vld [vmem:[#allocation2] sm:$0xff]  ;;  %s92_s18 = smov 1   ;;  %s93_s19 = smov [#allocation5]  }
  0x13   :  { %22 = vrot.lane.b32.xlu0 %v21_v0, %s92_s18  ;;  %s31_s20 = sshll.u32 %s93_s19, 4  ;;  %s32_s20 = int_to_ptr.vmem [resolvable:$true] %s31_s20 }
  0x14   :  { %s65_s21 = scalar_lea.vmem %s32_s20, 128  ;;  %p70_p9 = scmp.lt.s32.totalorder %s32_s20, %s32_s20 }
  0x15   :  { %p66_p8 = scmp.ne.s32.totalorder %s32_s20, %s65_s21  ;;  %p71_p10 = scmp.lt.s32.totalorder %s65_s21, %s65_s21 }
  0x17   :  { %p72_p11 = por %p71_p10, %p70_p9 }
  0x19   :  { %p73_p12 = pnand %p72_p11, %p66_p8 }
  0x85   :  { %v23_v1 = vpop.permute.xlu0 %22 }
  0x86   :  { %24 = vst [vmem:[#allocation5] sm:$0xff] %v23_v1 }
  0x87   :  { %76 = shalt.err (!%p73_p12)
}
  0x88   :  { %s77_s0 = scalar_lea.hbm %s129_s1, 128 }
  0x89   :  { %p78_p13 = scmp.ne.s32.totalorder %s129_s1, %s77_s0  ;;  %p81_p0 = scmp.lt.u32.totalorder %s77_s0, %s129_s1 }
  0x8b   :  { %p83_p1 = pnand %p81_p0, %p78_p13 }
  0x8d   :  { %86 = shalt.err (!%p83_p1)
}
  0x8e   :  { %34 = dma.vmem_to_hbm [thread:$0]  %s32_s20, 128, %s129_s1, [#allocation4]  }
  0x8f   :  { %89 = dma.done.wait [#allocation4], 128  }
  0x90   :  { %90 = vsyncadd [#allocation4], 4294967168 }
  0x91   :  { %38 = vsyncpa [#allocation3], 1 }
  0x92   :  { %39 = vsyncpa [#allocation4], 1 }

</bundles_post_ra>
